<compile_context>
chip_gen: v5e
topology: v5e:2x2
jax: 0.10.0
libtpu: 0.0.40
codegen_flags: <defaults>
</compile_context>

<pallas_src>
import functools
import math

import jax
import jax.numpy as jnp
from jax.experimental import pallas as pl
from jax.experimental.pallas import tpu as pltpu

HALF_LOG_2PI = 0.5 * math.log(2.0 * math.pi)

# Lane-dense (1, sublane, lane) slab used for the per-out-tile scalar partial sums:
# writing a full (8,128) tile avoids masked / lane-sparse vector stores.
_PART_BLOCK = (1, 8, 128)


def _softplus(x):
    # Numerically stable softplus: max(x, 0) + log1p(exp(-|x|))  (== log(1 + exp(x)))
    return jnp.maximum(x, 0.0) + jnp.log1p(jnp.exp(-jnp.abs(x)))


def bbb_kernel(x_ref, w_mu_ref, w_rho_ref, w_eps_ref,
               b_mu_ref, b_rho_ref, b_eps_ref,
               y_ref, prior_ref, post_ref,
               acc_ref, *, inv_2s2, mxu_dtype):
    k = pl.program_id(1)
    nk = pl.num_programs(1)

    # --- reparameterize the weight tile (VPU) ---
    w_eps = w_eps_ref[...]
    w_sigma = _softplus(w_rho_ref[...])
    w = w_mu_ref[...] + w_sigma * w_eps

    # --- per-tile log-prob partial sums (constant terms folded in the wrapper) ---
    #   prior:     log N(w; 0, s)      = -w^2 * inv_2s2                (const hoisted)
    #   posterior: log N(w; mu, sigma) = -0.5*eps^2 - log(sigma)       (const hoisted)
    prior_tile = -inv_2s2 * jnp.sum(w * w)
    post_tile = -0.5 * jnp.sum(w_eps * w_eps) - jnp.sum(jnp.log(w_sigma))

    @pl.when(k == 0)
    def _init():
        acc_ref[...] = jnp.zeros_like(acc_ref)
        # Bias slice owned by this out-tile: contribute its log-probs exactly once.
        b_eps = b_eps_ref[...]
        b_sigma = _softplus(b_rho_ref[...])
        b = b_mu_ref[...] + b_sigma * b_eps
        prior_ref[...] = jnp.full(_PART_BLOCK, -inv_2s2 * jnp.sum(b * b), jnp.float32)
        post_ref[...] = jnp.full(
            _PART_BLOCK,
            -0.5 * jnp.sum(b_eps * b_eps) - jnp.sum(jnp.log(b_sigma)),
            jnp.float32)

    # Accumulate this weight tile's partials into the resident per-out-tile slabs.
    prior_ref[...] += prior_tile
    post_ref[...] += post_tile

    # --- MXU hot path: y += x @ w.T, contracting on in_features (no w.T materialization) ---
    x_tile = x_ref[...]
    if mxu_dtype is not None:              # optional bf16 MXU operands (v6e/v7x)
        x_tile = x_tile.astype(mxu_dtype)
        w = w.astype(mxu_dtype)
    acc_ref[...] += jax.lax.dot_general(
        x_tile, w,
        dimension_numbers=(((1,), (1,)), ((), ())),
        preferred_element_type=jnp.float32)

    @pl.when(k == nk - 1)
    def _finalize():
        b = b_mu_ref[...] + _softplus(b_rho_ref[...]) * b_eps_ref[...]
        y_ref[...] = (acc_ref[...] + b).astype(y_ref.dtype)


def _pick_tile(dim, desired):
    """Largest tile <= desired that divides `dim` and keeps 128-lane alignment,
    or the full dim when it is already small enough."""
    if dim <= desired:
        return dim
    t = (desired // 128) * 128
    while t >= 128:
        if dim % t == 0:
            return t
        t -= 128
    return dim


def linear_bbb_forward(x, w_mu, w_rho, b_mu, b_rho, w_eps, b_eps, *,
                       prior_var=1.0, tile_n=256, tile_k=512, mxu_dtype=None):
    """Returns (y, log_prior, log_post). Bias params have shape (1, out_f)."""
    batch, in_f = x.shape
    out_f = w_mu.shape[0]

    tn = _pick_tile(out_f, tile_n)
    tk = _pick_tile(in_f, tile_k)
    n_i = out_f // tn
    n_k = in_f // tk

    prior_sigma = float(prior_var)          # torch Normal(0, prior_var): second arg is the scale
    inv_2s2 = 1.0 / (2.0 * prior_sigma * prior_sigma)
    kernel = functools.partial(bbb_kernel, inv_2s2=inv_2s2, mxu_dtype=mxu_dtype)

    # TODO(synk): for small out_f (< 128) the y store is lane-sparse; padding out_f to 128 in
    # the wrapper would make it lane-dense, skipped here to keep exact module output shapes.
    y, prior_parts, post_parts = pl.pallas_call(
        kernel,
        out_shape=(
            jax.ShapeDtypeStruct((batch, out_f), jnp.float32),
            jax.ShapeDtypeStruct((n_i,) + _PART_BLOCK[1:], jnp.float32),
            jax.ShapeDtypeStruct((n_i,) + _PART_BLOCK[1:], jnp.float32),
        ),
        grid_spec=pltpu.PrefetchScalarGridSpec(
            num_scalar_prefetch=0,
            grid=(n_i, n_k),
            in_specs=[
                pl.BlockSpec((batch, tk), lambda i, k: (0, k)),   # x
                pl.BlockSpec((tn, tk), lambda i, k: (i, k)),      # w_mu
                pl.BlockSpec((tn, tk), lambda i, k: (i, k)),      # w_rho
                pl.BlockSpec((tn, tk), lambda i, k: (i, k)),      # w_eps
                pl.BlockSpec((1, tn), lambda i, k: (0, i)),       # b_mu
                pl.BlockSpec((1, tn), lambda i, k: (0, i)),       # b_rho
                pl.BlockSpec((1, tn), lambda i, k: (0, i)),       # b_eps
            ],
            out_specs=(
                pl.BlockSpec((batch, tn), lambda i, k: (0, i)),       # y (resident over k)
                pl.BlockSpec(_PART_BLOCK, lambda i, k: (i, 0, 0)),    # log-prior partials
                pl.BlockSpec(_PART_BLOCK, lambda i, k: (i, 0, 0)),    # log-post partials
            ),
            scratch_shapes=[pltpu.VMEM((batch, tn), jnp.float32)],    # f32 matmul accumulator
        ),
        compiler_params=pltpu.CompilerParams(
            # out_f tiles are independent -> megacore-parallel (2 TCs on v7x);
            # in_f is the reduction axis -> arbitrary, innermost.
            dimension_semantics=("parallel", "arbitrary"),
            vmem_limit_bytes=48 * 1024 * 1024,
        ),
    )(x, w_mu, w_rho, w_eps, b_mu, b_rho, b_eps)

    # Fold back the constant terms hoisted out of the per-element kernel math.
    n_params = out_f * in_f + out_f
    log_prior = jnp.sum(prior_parts[:, 0, 0]) - n_params * (math.log(prior_sigma) + HALF_LOG_2PI)
    log_post = jnp.sum(post_parts[:, 0, 0]) - n_params * HALF_LOG_2PI
    return y, log_prior, log_post


def _reference(x, w_mu, w_rho, b_mu, b_rho, w_eps, b_eps, prior_var):
    """Pure-JAX reference implementing the same math as the PyTorch forward."""
    w_sigma = jnp.log1p(jnp.exp(w_rho))
    b_sigma = jnp.log1p(jnp.exp(b_rho))
    w = w_mu + w_sigma * w_eps
    b = b_mu + b_sigma * b_eps
    y = jnp.dot(x, w.T, precision=jax.lax.Precision.HIGHEST) + b

    def lp(v, mu, sigma):
        return -((v - mu) ** 2) / (2.0 * sigma * sigma) - jnp.log(sigma) - HALF_LOG_2PI

    log_prior = jnp.sum(lp(w, 0.0, prior_var)) + jnp.sum(lp(b, 0.0, prior_var))
    log_post = jnp.sum(lp(w, w_mu, w_sigma)) + jnp.sum(lp(b, b_mu, b_sigma))
    return y, log_prior, log_post


if __name__ == "__main__":
    prior_var = 1.0

    def make_inputs(key, batch, in_f, out_f, zero_mu):
        kx, kwmu, kwrho, kbrho, kweps, kbeps = jax.random.split(key, 6)
        x = jax.random.normal(kx, (batch, in_f), dtype=jnp.float32)
        if zero_mu:   # module __init__ uses zeros for the means
            w_mu = jnp.zeros((out_f, in_f), dtype=jnp.float32)
        else:
            w_mu = jax.random.normal(kwmu, (out_f, in_f), dtype=jnp.float32)
        w_rho = 0.1 * jax.random.normal(kwrho, (out_f, in_f), dtype=jnp.float32)
        b_mu = jnp.zeros((1, out_f), dtype=jnp.float32)
        b_rho = 0.1 * jax.random.normal(kbrho, (1, out_f), dtype=jnp.float32)
        w_eps = jax.random.normal(kweps, (out_f, in_f), dtype=jnp.float32)
        b_eps = jax.random.normal(kbeps, (1, out_f), dtype=jnp.float32)
        return x, w_mu, w_rho, b_mu, b_rho, w_eps, b_eps

    key = jax.random.PRNGKey(0)
    k1, k2 = jax.random.split(key)

    # --- small, module-like shapes (single grid step) ---
    args1 = make_inputs(k1, batch=8, in_f=32, out_f=16, zero_mu=True)
    y1, lp1, lq1 = linear_bbb_forward(*args1, prior_var=prior_var)
    jax.block_until_ready((y1, lp1, lq1))
    y1_r, lp1_r, lq1_r = _reference(*args1, prior_var)
    assert jnp.allclose(y1, y1_r, atol=1e-4, rtol=1e-4)
    assert jnp.allclose(lp1, lp1_r, atol=1e-3, rtol=1e-4)
    assert jnp.allclose(lq1, lq1_r, atol=1e-3, rtol=1e-4)

    # --- multi-tile path: exercises the (out_f, in_f) grid, accumulators, and partials ---
    args2 = make_inputs(k2, batch=16, in_f=256, out_f=256, zero_mu=False)
    y2, lp2, lq2 = linear_bbb_forward(*args2, prior_var=prior_var, tile_n=128, tile_k=128)
    jax.block_until_ready((y2, lp2, lq2))
    y2_r, lp2_r, lq2_r = _reference(*args2, prior_var)
    assert jnp.allclose(y2, y2_r, atol=1e-2, rtol=1e-3)
    assert jnp.allclose(lp2, lp2_r, rtol=1e-3)
    assert jnp.allclose(lq2, lq2_r, rtol=1e-3)

    print("KERNEL_OK")
</pallas_src>

<mosaic_0001>
module attributes {stable_mosaic.version = 11 : i64} {
  func.func @bbb_kernel(%arg0: i32, %arg1: i32, %arg2: memref<8x32xf32, #tpu.memory_space<vmem>>, %arg3: memref<16x32xf32, #tpu.memory_space<vmem>>, %arg4: memref<16x32xf32, #tpu.memory_space<vmem>>, %arg5: memref<16x32xf32, #tpu.memory_space<vmem>>, %arg6: memref<1x16xf32, #tpu.memory_space<vmem>>, %arg7: memref<1x16xf32, #tpu.memory_space<vmem>>, %arg8: memref<1x16xf32, #tpu.memory_space<vmem>>, %arg9: memref<8x16xf32, #tpu.memory_space<vmem>>, %arg10: memref<1x8x128xf32, #tpu.memory_space<vmem>>, %arg11: memref<1x8x128xf32, #tpu.memory_space<vmem>>, %arg12: memref<8x16xf32, #tpu.memory_space<vmem>>) attributes {dimension_semantics = [#tpu.dimension_semantics<parallel>, #tpu.dimension_semantics<arbitrary>], iteration_bounds = array<i64: 1, 1>, scalar_prefetch = 0 : i64, scratch_operands = 1 : i64, tpu.core_type = #tpu.core_type<tc>, window_params = [{transform_indices = @transform_0, window_bounds = array<i64: 8, 32>}, {transform_indices = @transform_1, window_bounds = array<i64: 16, 32>}, {transform_indices = @transform_2, window_bounds = array<i64: 16, 32>}, {transform_indices = @transform_3, window_bounds = array<i64: 16, 32>}, {transform_indices = @transform_4, window_bounds = array<i64: 1, 16>}, {transform_indices = @transform_5, window_bounds = array<i64: 1, 16>}, {transform_indices = @transform_6, window_bounds = array<i64: 1, 16>}, {transform_indices = @transform_7, window_bounds = array<i64: 8, 16>}, {transform_indices = @transform_8, window_bounds = array<i64: 1, 8, 128>}, {transform_indices = @transform_9, window_bounds = array<i64: 1, 8, 128>}]} {
    %c0 = arith.constant 0 : index
    %c0_0 = arith.constant 0 : index
    %0 = vector.load %arg5[%c0, %c0_0] : memref<16x32xf32, #tpu.memory_space<vmem>>, vector<16x32xf32>
    %c0_1 = arith.constant 0 : index
    %c0_2 = arith.constant 0 : index
    %1 = vector.load %arg4[%c0_1, %c0_2] : memref<16x32xf32, #tpu.memory_space<vmem>>, vector<16x32xf32>
    %cst = arith.constant 0.000000e+00 : f32
    %2 = vector.broadcast %cst : f32 to vector<16x32xf32>
    %3 = arith.maximumf %1, %2 : vector<16x32xf32>
    %4 = math.absf %1 : vector<16x32xf32>
    %cst_3 = arith.constant 0.000000e+00 : f32
    %5 = vector.broadcast %cst_3 : f32 to vector<16x32xf32>
    %6 = arith.subf %5, %4 : vector<16x32xf32>
    %7 = math.exp %6 : vector<16x32xf32>
    %8 = math.log1p %7 : vector<16x32xf32>
    %9 = arith.addf %3, %8 : vector<16x32xf32>
    %c0_4 = arith.constant 0 : index
    %c0_5 = arith.constant 0 : index
    %10 = vector.load %arg3[%c0_4, %c0_5] : memref<16x32xf32, #tpu.memory_space<vmem>>, vector<16x32xf32>
    %11 = arith.mulf %9, %0 : vector<16x32xf32>
    %12 = arith.addf %10, %11 : vector<16x32xf32>
    %13 = arith.mulf %12, %12 : vector<16x32xf32>
    %14 = vector.shape_cast %13 : vector<16x32xf32> to vector<1x16x32xf32>
    %cst_6 = arith.constant dense<0.000000e+00> : vector<1xf32>
    %15 = vector.multi_reduction <add>, %14, %cst_6 [1, 2] : vector<1x16x32xf32> to vector<1xf32>
    %16 = vector.shape_cast %15 : vector<1xf32> to vector<1x1x1xf32>
    %17 = vector.extract %16[0, 0, 0] : f32 from vector<1x1x1xf32>
    %cst_7 = arith.constant -5.000000e-01 : f32
    %18 = arith.mulf %cst_7, %17 : f32
    %19 = arith.mulf %0, %0 : vector<16x32xf32>
    %20 = vector.shape_cast %19 : vector<16x32xf32> to vector<1x16x32xf32>
    %cst_8 = arith.constant dense<0.000000e+00> : vector<1xf32>
    %21 = vector.multi_reduction <add>, %20, %cst_8 [1, 2] : vector<1x16x32xf32> to vector<1xf32>
    %22 = vector.shape_cast %21 : vector<1xf32> to vector<1x1x1xf32>
    %23 = vector.extract %22[0, 0, 0] : f32 from vector<1x1x1xf32>
    %cst_9 = arith.constant -5.000000e-01 : f32
    %24 = arith.mulf %cst_9, %23 : f32
    %25 = math.log %9 : vector<16x32xf32>
    %26 = vector.shape_cast %25 : vector<16x32xf32> to vector<1x16x32xf32>
    %cst_10 = arith.constant dense<0.000000e+00> : vector<1xf32>
    %27 = vector.multi_reduction <add>, %26, %cst_10 [1, 2] : vector<1x16x32xf32> to vector<1xf32>
    %28 = vector.shape_cast %27 : vector<1xf32> to vector<1x1x1xf32>
    %29 = vector.extract %28[0, 0, 0] : f32 from vector<1x1x1xf32>
    %30 = arith.subf %24, %29 : f32
    %c0_i32 = arith.constant 0 : i32
    %31 = arith.cmpi eq, %arg1, %c0_i32 : i32
    %32 = arith.extui %31 : i1 to i32
    %c0_i32_11 = arith.constant 0 : i32
    %33 = arith.cmpi ne, %32, %c0_i32_11 : i32
    scf.if %33 {
      %cst_33 = arith.constant 0.000000e+00 : f32
      %50 = vector.broadcast %cst_33 : f32 to vector<8x16xf32>
      %c0_34 = arith.constant 0 : index
      %c0_35 = arith.constant 0 : index
      %51 = vector.load %arg12[%c0_34, %c0_35] : memref<8x16xf32, #tpu.memory_space<vmem>>, vector<8x16xf32>
      tpu.vector_store %arg12[%c0_34, %c0_35], %50 {strides = array<i32>} : memref<8x16xf32, #tpu.memory_space<vmem>>, vector<8x16xf32>,
      %c0_36 = arith.constant 0 : index
      %c0_37 = arith.constant 0 : index
      %52 = vector.load %arg8[%c0_36, %c0_37] : memref<1x16xf32, #tpu.memory_space<vmem>>, vector<1x16xf32>
      %c0_38 = arith.constant 0 : index
      %c0_39 = arith.constant 0 : index
      %53 = vector.load %arg7[%c0_38, %c0_39] : memref<1x16xf32, #tpu.memory_space<vmem>>, vector<1x16xf32>
      %cst_40 = arith.constant 0.000000e+00 : f32
      %54 = vector.broadcast %cst_40 : f32 to vector<1x16xf32>
      %55 = arith.maximumf %53, %54 : vector<1x16xf32>
      %56 = math.absf %53 : vector<1x16xf32>
      %cst_41 = arith.constant 0.000000e+00 : f32
      %57 = vector.broadcast %cst_41 : f32 to vector<1x16xf32>
      %58 = arith.subf %57, %56 : vector<1x16xf32>
      %59 = math.exp %58 : vector<1x16xf32>
      %60 = math.log1p %59 : vector<1x16xf32>
      %61 = arith.addf %55, %60 : vector<1x16xf32>
      %c0_42 = arith.constant 0 : index
      %c0_43 = arith.constant 0 : index
      %62 = vector.load %arg6[%c0_42, %c0_43] : memref<1x16xf32, #tpu.memory_space<vmem>>, vector<1x16xf32>
      %63 = arith.mulf %61, %52 : vector<1x16xf32>
      %64 = arith.addf %62, %63 : vector<1x16xf32>
      %65 = arith.mulf %64, %64 : vector<1x16xf32>
      %66 = vector.shape_cast %65 : vector<1x16xf32> to vector<1x1x16xf32>
      %cst_44 = arith.constant dense<0.000000e+00> : vector<1xf32>
      %67 = vector.multi_reduction <add>, %66, %cst_44 [1, 2] : vector<1x1x16xf32> to vector<1xf32>
      %68 = vector.shape_cast %67 : vector<1xf32> to vector<1x1x1xf32>
      %69 = vector.extract %68[0, 0, 0] : f32 from vector<1x1x1xf32>
      %cst_45 = arith.constant -5.000000e-01 : f32
      %70 = arith.mulf %cst_45, %69 : f32
      %71 = vector.broadcast %70 : f32 to vector<1x8x128xf32>
      %c0_46 = arith.constant 0 : index
      %c0_47 = arith.constant 0 : index
      %c0_48 = arith.constant 0 : index
      %72 = vector.load %arg10[%c0_46, %c0_47, %c0_48] : memref<1x8x128xf32, #tpu.memory_space<vmem>>, vector<1x8x128xf32>
      tpu.vector_store %arg10[%c0_46, %c0_47, %c0_48], %71 {strides = array<i32>} : memref<1x8x128xf32, #tpu.memory_space<vmem>>, vector<1x8x128xf32>,
      %73 = arith.mulf %52, %52 : vector<1x16xf32>
      %74 = vector.shape_cast %73 : vector<1x16xf32> to vector<1x1x16xf32>
      %cst_49 = arith.constant dense<0.000000e+00> : vector<1xf32>
      %75 = vector.multi_reduction <add>, %74, %cst_49 [1, 2] : vector<1x1x16xf32> to vector<1xf32>
      %76 = vector.shape_cast %75 : vector<1xf32> to vector<1x1x1xf32>
      %77 = vector.extract %76[0, 0, 0] : f32 from vector<1x1x1xf32>
      %cst_50 = arith.constant -5.000000e-01 : f32
      %78 = arith.mulf %cst_50, %77 : f32
      %79 = math.log %61 : vector<1x16xf32>
      %80 = vector.shape_cast %79 : vector<1x16xf32> to vector<1x1x16xf32>
      %cst_51 = arith.constant dense<0.000000e+00> : vector<1xf32>
      %81 = vector.multi_reduction <add>, %80, %cst_51 [1, 2] : vector<1x1x16xf32> to vector<1xf32>
      %82 = vector.shape_cast %81 : vector<1xf32> to vector<1x1x1xf32>
      %83 = vector.extract %82[0, 0, 0] : f32 from vector<1x1x1xf32>
      %84 = arith.subf %78, %83 : f32
      %85 = vector.broadcast %84 : f32 to vector<1x8x128xf32>
      %c0_52 = arith.constant 0 : index
      %c0_53 = arith.constant 0 : index
      %c0_54 = arith.constant 0 : index
      %86 = vector.load %arg11[%c0_52, %c0_53, %c0_54] : memref<1x8x128xf32, #tpu.memory_space<vmem>>, vector<1x8x128xf32>
      tpu.vector_store %arg11[%c0_52, %c0_53, %c0_54], %85 {strides = array<i32>} : memref<1x8x128xf32, #tpu.memory_space<vmem>>, vector<1x8x128xf32>,
    } else {
    }
    %c0_12 = arith.constant 0 : index
    %c0_13 = arith.constant 0 : index
    %c0_14 = arith.constant 0 : index
    %34 = vector.load %arg10[%c0_12, %c0_13, %c0_14] : memref<1x8x128xf32, #tpu.memory_space<vmem>>, vector<1x8x128xf32>
    %35 = vector.broadcast %18 : f32 to vector<1x8x128xf32>
    %36 = arith.addf %34, %35 : vector<1x8x128xf32>
    %c0_15 = arith.constant 0 : index
    %c0_16 = arith.constant 0 : index
    %c0_17 = arith.constant 0 : index
    %37 = vector.load %arg10[%c0_15, %c0_16, %c0_17] : memref<1x8x128xf32, #tpu.memory_space<vmem>>, vector<1x8x128xf32>
    tpu.vector_store %arg10[%c0_15, %c0_16, %c0_17], %36 {strides = array<i32>} : memref<1x8x128xf32, #tpu.memory_space<vmem>>, vector<1x8x128xf32>,
    %c0_18 = arith.constant 0 : index
    %c0_19 = arith.constant 0 : index
    %c0_20 = arith.constant 0 : index
    %38 = vector.load %arg11[%c0_18, %c0_19, %c0_20] : memref<1x8x128xf32, #tpu.memory_space<vmem>>, vector<1x8x128xf32>
    %39 = vector.broadcast %30 : f32 to vector<1x8x128xf32>
    %40 = arith.addf %38, %39 : vector<1x8x128xf32>
    %c0_21 = arith.constant 0 : index
    %c0_22 = arith.constant 0 : index
    %c0_23 = arith.constant 0 : index
    %41 = vector.load %arg11[%c0_21, %c0_22, %c0_23] : memref<1x8x128xf32, #tpu.memory_space<vmem>>, vector<1x8x128xf32>
    tpu.vector_store %arg11[%c0_21, %c0_22, %c0_23], %40 {strides = array<i32>} : memref<1x8x128xf32, #tpu.memory_space<vmem>>, vector<1x8x128xf32>,
    %c0_24 = arith.constant 0 : index
    %c0_25 = arith.constant 0 : index
    %42 = vector.load %arg2[%c0_24, %c0_25] : memref<8x32xf32, #tpu.memory_space<vmem>>, vector<8x32xf32>
    %c0_26 = arith.constant 0 : index
    %c0_27 = arith.constant 0 : index
    %43 = vector.load %arg12[%c0_26, %c0_27] : memref<8x16xf32, #tpu.memory_space<vmem>>, vector<8x16xf32>
    %cst_28 = arith.constant dense<0.000000e+00> : vector<8x16xf32>
    %44 = tpu.matmul %42, %12, %cst_28 {dimension_numbers = #tpu.dot_dimension_numbers<[1], [1], [0], [0], [0, 0, 1, 0], [], []>} : vector<8x32xf32>, vector<16x32xf32>, vector<8x16xf32> -> vector<8x16xf32>
    %45 = arith.addf %43, %44 : vector<8x16xf32>
    %c0_29 = arith.constant 0 : index
    %c0_30 = arith.constant 0 : index
    %46 = vector.load %arg12[%c0_29, %c0_30] : memref<8x16xf32, #tpu.memory_space<vmem>>, vector<8x16xf32>
    tpu.vector_store %arg12[%c0_29, %c0_30], %45 {strides = array<i32>} : memref<8x16xf32, #tpu.memory_space<vmem>>, vector<8x16xf32>,
    %c0_i32_31 = arith.constant 0 : i32
    %47 = arith.cmpi eq, %arg1, %c0_i32_31 : i32
    %48 = arith.extui %47 : i1 to i32
    %c0_i32_32 = arith.constant 0 : i32
    %49 = arith.cmpi ne, %48, %c0_i32_32 : i32
    scf.if %49 {
      %c0_33 = arith.constant 0 : index
      %c0_34 = arith.constant 0 : index
      %50 = vector.load %arg6[%c0_33, %c0_34] : memref<1x16xf32, #tpu.memory_space<vmem>>, vector<1x16xf32>
      %c0_35 = arith.constant 0 : index
      %c0_36 = arith.constant 0 : index
      %51 = vector.load %arg7[%c0_35, %c0_36] : memref<1x16xf32, #tpu.memory_space<vmem>>, vector<1x16xf32>
      %cst_37 = arith.constant 0.000000e+00 : f32
      %52 = vector.broadcast %cst_37 : f32 to vector<1x16xf32>
      %53 = arith.maximumf %51, %52 : vector<1x16xf32>
      %54 = math.absf %51 : vector<1x16xf32>
      %cst_38 = arith.constant 0.000000e+00 : f32
      %55 = vector.broadcast %cst_38 : f32 to vector<1x16xf32>
      %56 = arith.subf %55, %54 : vector<1x16xf32>
      %57 = math.exp %56 : vector<1x16xf32>
      %58 = math.log1p %57 : vector<1x16xf32>
      %59 = arith.addf %53, %58 : vector<1x16xf32>
      %c0_39 = arith.constant 0 : index
      %c0_40 = arith.constant 0 : index
      %60 = vector.load %arg8[%c0_39, %c0_40] : memref<1x16xf32, #tpu.memory_space<vmem>>, vector<1x16xf32>
      %61 = arith.mulf %59, %60 : vector<1x16xf32>
      %62 = arith.addf %50, %61 : vector<1x16xf32>
      %c0_41 = arith.constant 0 : index
      %c0_42 = arith.constant 0 : index
      %63 = vector.load %arg12[%c0_41, %c0_42] : memref<8x16xf32, #tpu.memory_space<vmem>>, vector<8x16xf32>
      %64 = vector.broadcast %62 : vector<1x16xf32> to vector<8x16xf32>
      %65 = arith.addf %63, %64 : vector<8x16xf32>
      %c0_43 = arith.constant 0 : index
      %c0_44 = arith.constant 0 : index
      %66 = vector.load %arg9[%c0_43, %c0_44] : memref<8x16xf32, #tpu.memory_space<vmem>>, vector<8x16xf32>
      tpu.vector_store %arg9[%c0_43, %c0_44], %65 {strides = array<i32>} : memref<8x16xf32, #tpu.memory_space<vmem>>, vector<8x16xf32>,
    } else {
    }
    return
  }
  func.func @transform_0(%arg0: i32, %arg1: i32) -> (i32, i32) {
    %c0_i32 = arith.constant 0 : i32
    %c0_i32_0 = arith.constant 0 : i32
    return %c0_i32, %arg1 : i32, i32
  }
  func.func @transform_1(%arg0: i32, %arg1: i32) -> (i32, i32) {
    %c0_i32 = arith.constant 0 : i32
    return %arg0, %arg1 : i32, i32
  }
  func.func @transform_2(%arg0: i32, %arg1: i32) -> (i32, i32) {
    %c0_i32 = arith.constant 0 : i32
    return %arg0, %arg1 : i32, i32
  }
  func.func @transform_3(%arg0: i32, %arg1: i32) -> (i32, i32) {
    %c0_i32 = arith.constant 0 : i32
    return %arg0, %arg1 : i32, i32
  }
  func.func @transform_4(%arg0: i32, %arg1: i32) -> (i32, i32) {
    %c0_i32 = arith.constant 0 : i32
    %c0_i32_0 = arith.constant 0 : i32
    return %c0_i32, %arg0 : i32, i32
  }
  func.func @transform_5(%arg0: i32, %arg1: i32) -> (i32, i32) {
    %c0_i32 = arith.constant 0 : i32
    %c0_i32_0 = arith.constant 0 : i32
    return %c0_i32, %arg0 : i32, i32
  }
  func.func @transform_6(%arg0: i32, %arg1: i32) -> (i32, i32) {
    %c0_i32 = arith.constant 0 : i32
    %c0_i32_0 = arith.constant 0 : i32
    return %c0_i32, %arg0 : i32, i32
  }
  func.func @transform_7(%arg0: i32, %arg1: i32) -> (i32, i32) {
    %c0_i32 = arith.constant 0 : i32
    %c0_i32_0 = arith.constant 0 : i32
    return %c0_i32, %arg0 : i32, i32
  }
  func.func @transform_8(%arg0: i32, %arg1: i32) -> (i32, i32, i32) {
    %c0_i32 = arith.constant 0 : i32
    %c0_i32_0 = arith.constant 0 : i32
    %c0_i32_1 = arith.constant 0 : i32
    return %arg0, %c0_i32, %c0_i32_0 : i32, i32, i32
  }
  func.func @transform_9(%arg0: i32, %arg1: i32) -> (i32, i32, i32) {
    %c0_i32 = arith.constant 0 : i32
    %c0_i32_0 = arith.constant 0 : i32
    %c0_i32_1 = arith.constant 0 : i32
    return %arg0, %c0_i32, %c0_i32_0 : i32, i32, i32
  }
}

</mosaic_0001>

<bundles_post_ra>
// kernel: tpu_custom_call.1
= control target key start
LH: loop header
LB: loop body
LE: loop exit
PB: predicated region body
PF: predicated region fallthrough
CT: control target
= control target key end

     0   :  { %15 = vsyncpa [#allocation4], 0  ;;  %s713_s0 = inlined_call_operand.hbm [shape: f32[8,32], index: 0, kind: input, shape index: {}]   ;;  %s714_s1 = inlined_call_operand.hbm [shape: f32[16,32], index: 1, kind: input, shape index: {}]   ;;  %s715_s2 = inlined_call_operand.hbm [shape: f32[16,32], index: 2, kind: input, shape index: {}]   ;;  %s716_s3 = inlined_call_operand.hbm [shape: f32[16,32], index: 3, kind: input, shape index: {}]   ;;  %s717_s4 = inlined_call_operand.vmem [shape: f32[1,16], index: 4, kind: input, shape index: {}]   ;;  %s718_s5 = inlined_call_operand.vmem [shape: f32[1,16], index: 5, kind: input, shape index: {}]   ;;  %s719_s6 = inlined_call_operand.vmem [shape: f32[1,16], index: 6, kind: input, shape index: {}]   ;;  %s720_s7 = inlined_call_operand.hbm [shape: f32[8,16], index: 7, kind: output, shape index: {0}]   ;;  %s721_s8 = inlined_call_operand.hbm [shape: f32[1,8,128], index: 8, kind: output, shape index: {1}]   ;;  %s722_s9 = inlined_call_operand.hbm [shape: f32[1,8,128], index: 9, kind: output, shape index: {2}]  }
   0x1   :  { %16 = vsyncpa [#allocation7], 0 }
   0x2   :  { %17 = vsyncpa [#allocation10], 0 }
   0x3   :  { %18 = vsyncpa [#allocation5], 0  ;;  %s35_s11 = sshll.u32 %s714_s1, 4  ;;  %s36_s11 = int_to_ptr.hbm [resolvable:$true] %s35_s11 }
   0x4   :  { %19 = vsyncpa [#allocation13], 0  ;;  %s594_s12 = smov [#allocation6]   ;;  %s25_s16 = sshll.u32 %s713_s0, 4  ;;  %s26_s16 = int_to_ptr.hbm [resolvable:$true] %s25_s16 }
   0x5   :  { %s37_s13 = sshll.u32 %s594_s12, 4  ;;  %s595_s17 = smov 128   ;;  %s38_s13 = int_to_ptr.vmem [resolvable:$true] %s37_s13 }
   0x6   :  { %s596_s18 = smov 8   ;;  %s597_s19 = smov [#allocation3]  }
   0x7   :  { %43 = dma.hbm_to_vmem [thread:$0]  %s36_s11, 256, %s38_s13, [#allocation7], %s595_s17, %s595_s17, %s596_s18  }
   0x8   :  { %s27_s20 = sshll.u32 %s597_s19, 4  ;;  %s48_s23 = sshll.u32 %s715_s2, 4  ;;  %s28_s20 = int_to_ptr.vmem [resolvable:$true] %s27_s20  ;;  %s49_s23 = int_to_ptr.hbm [resolvable:$true] %s48_s23 }
   0x9   :  { %30 = dma.hbm_to_vmem [thread:$0]  %s26_s16, 128, %s28_s20, [#allocation4]  }
   0xa   :  { %s61_s25 = sshll.u32 %s716_s3, 4  ;;  %s598_s26 = smov [#allocation8]   ;;  %s62_s25 = int_to_ptr.hbm [resolvable:$true] %s61_s25 }
   0xb   :  { %s50_s27 = sshll.u32 %s598_s26, 4  ;;  %s599_s0 = smov [#allocation9]   ;;  %s51_s27 = int_to_ptr.vmem [resolvable:$true] %s50_s27 }
   0xc   :  { %56 = dma.hbm_to_vmem [thread:$0]  %s49_s23, 256, %s51_s27, [#allocation7], %s595_s17, %s595_s17, %s596_s18  }
   0xd   :  { %s63_s28 = sshll.u32 %s599_s0, 4  ;;  %s64_s28 = int_to_ptr.vmem [resolvable:$true] %s63_s28 }
   0xe   :  { %69 = dma.hbm_to_vmem [thread:$0]  %s62_s25, 256, %s64_s28, [#allocation10], %s595_s17, %s595_s17, %s596_s18  }
   0xf   :  { %584 = dma.done.wait [#allocation4], 128  }
  0x10   :  { %585 = vsyncadd [#allocation4], 4294967168 }
  0x11   :  { %586 = dma.done.wait [#allocation7], 512  }
  0x12   :  { %587 = vsyncadd [#allocation7], 4294966784 }
  0x13   :  { %588 = dma.done.wait [#allocation10], 256  }
  0x14   :  { %589 = vsyncadd [#allocation10], 4294967040  ;;  %v669_v0 = vld [vmem:[%s719_s6] sm:$0x1]  ;;  %vm207_vm0 = vcmask 122880   ;;  %v95_v5 = vld [vmem:[#allocation8 + $0x8] sm:$0xff] }
  0x15   :  { %v187_v1 = vld [vmem:[%s718_s5] sm:$0x1]  ;;  %v221_v3 = vmul.f32 %v669_v0, %v669_v0  ;;  %v99_v7 = vand.u32 2147483647, %v95_v5  ;;  %v97_v39 = vmax.f32 %v95_v5, 0.0  ;;  %v92_v44 = vld [vmem:[#allocation9] sm:$0xff] }
  0x16   :  { %v189_v2 = vand.u32 2147483647, %v187_v1  ;;  %v94_v4 = vld [vmem:[#allocation8] sm:$0xff]  ;;  %v188_v32 = vmax.f32 %v187_v1, 0.0  ;;  %v93_v46 = vld [vmem:[#allocation9 + $0x8] sm:$0xff]  ;;  %v126_v50 = vld [vmem:[#allocation6] sm:$0xff] }
  0x17   :  { %v98_v6 = vand.u32 2147483647, %v94_v4  ;;  %v222_v9 = vsel %vm207_vm0, %v221_v3, 0.0  ;;  %v101_v11 = vsub.f32 0.0, %v99_v7  ;;  %v96_v36 = vmax.f32 %v94_v4, 0.0  ;;  %v127_v51 = vld [vmem:[#allocation6 + $0x8] sm:$0xff] }
  0x18   :  { %v190_v8 = vsub.f32 0.0, %v189_v2  ;;  %223 = vadd.xlane.f32.xlu2 %v222_v9  ;;  %vm134_vm4 = vcmask 261120   ;;  %v148_v3 = vmul.f32 %v92_v44, %v92_v44  ;;  %v149_v4 = vmul.f32 %v93_v46, %v93_v46  ;;  %v203_v5 = vld [vmem:[%s717_s4] sm:$0x1]  ;;  %s601_s17 = smov [#allocation11]   ;;  %s326_s21 = sshll.u32 %s720_s7, 4  ;;  %s327_s21 = int_to_ptr.hbm [resolvable:$true] %s326_s21 }
  0x19   :  { %v100_v10 = vsub.f32 0.0, %v98_v6  ;;  %v104_v14 = vmul.f32 1.442695, %v101_v11  ;;  %vm184_vm5 = vcmask 130048   ;;  %s324_s18 = sshll.u32 %s601_s17, 4  ;;  %s337_s23 = sshll.u32 %s721_s8, 4  ;;  %s325_s18 = int_to_ptr.vmem [resolvable:$true] %s324_s18  ;;  %s338_s23 = int_to_ptr.hbm [resolvable:$true] %s337_s23 }
  0x1a   :  { %v191_v12 = vmul.f32 1.442695, %v190_v8  ;;  %s602_s1 = smov [#allocation12]   ;;  %s348_s29 = sshll.u32 %s722_s9, 4  ;;  %s349_s29 = int_to_ptr.hbm [resolvable:$true] %s348_s29 }
  0x1b   :  { %v102_v13 = vmul.f32 1.442695, %v100_v10  ;;  %s335_s24 = sshll.u32 %s602_s1, 4  ;;  %s603_s12 = smov [#allocation14]   ;;  %s336_s24 = int_to_ptr.vmem [resolvable:$true] %s335_s24 }
  0x1c   :  { %394 = vpow2.f32 %v191_v12  ;;  %s346_s13 = sshll.u32 %s603_s12, 4  ;;  %s347_s13 = int_to_ptr.vmem [resolvable:$true] %s346_s13 }
  0x1d   :  { %396 = vpow2.f32 %v102_v13  ;;  %v150_v13 = vsel %vm134_vm4, %v148_v3, 0.0  ;;  %v600_v3 = vmov 0.0  }
  0x1e   :  { %398 = vpow2.f32 %v104_v14  ;;  %v151_v14 = vsel %vm134_vm4, %v149_v4, 0.0  ;;  %185 = vst.msk [vmem:[#allocation2] sm:$0xff] %vm184_vm5, %v600_v3 }
  0x22   :  { %v395_v15 = vpop.eup %394 }
  0x23   :  { %v397_v16 = vpop.eup %396  ;;  %v193_v17 = vadd.f32 1.0, %v395_v15  ;;  %v196_v18 = vmul.f32 -0.5, %v395_v15  ;;  %v199_v25 = vand.u32 2147483647, %v395_v15 }
  0x24   :  { %v399_v19 = vpop.eup %398  ;;  %v106_v20 = vadd.f32 1.0, %v397_v16  ;;  %v109_v21 = vmul.f32 -0.5, %v397_v16  ;;  %v112_v27 = vand.u32 2147483647, %v397_v16 }
  0x25   :  { %400 = vlog2.f32 %v193_v17  ;;  %v115_v22 = vadd.f32 1.0, %v399_v19  ;;  %v197_v23 = vadd.f32 1.0, %v196_v18  ;;  %v118_v24 = vmul.f32 -0.5, %v399_v19 }
  0x26   :  { %402 = vlog2.f32 %v106_v20  ;;  %v110_v26 = vadd.f32 1.0, %v109_v21  ;;  %v121_v29 = vand.u32 2147483647, %v399_v19  ;;  %vm200_vm1 = vcmp.lt.f32.partialorder %v199_v25, 0.0004427343 }
  0x27   :  { %404 = vlog2.f32 %v115_v22  ;;  %v119_v28 = vadd.f32 1.0, %v118_v24  ;;  %v198_v30 = vmul.f32 %v395_v15, %v197_v23  ;;  %vm113_vm2 = vcmp.lt.f32.partialorder %v112_v27, 0.0004427343 }
  0x28   :  { %v111_v33 = vmul.f32 %v397_v16, %v110_v26  ;;  %vm122_vm3 = vcmp.lt.f32.partialorder %v121_v29, 0.0004427343  ;;  %v152_v15 = vadd.f32 %v151_v14, %v150_v13 }
  0x29   :  { %v120_v37 = vmul.f32 %v399_v19, %v119_v28 }
  0x2b   :  { %v401_v31 = vpop.eup %400 }
  0x2c   :  { %v403_v34 = vpop.eup %402  ;;  %v195_v35 = vmul.f32 0.6931472, %v401_v31 }
  0x2d   :  { %v405_v38 = vpop.eup %404  ;;  %v108_v40 = vmul.f32 0.6931472, %v403_v34 }
  0x2e   :  { %v201_v41 = vsel %vm200_vm1, %v198_v30, %v195_v35  ;;  %v117_v42 = vmul.f32 0.6931472, %v405_v38 }
  0x2f   :  { %v202_v43 = vadd.f32 %v201_v41, %v188_v32  ;;  %v114_v45 = vsel %vm113_vm2, %v111_v33, %v108_v40 }
  0x30   :  { %v123_v47 = vsel %vm122_vm3, %v120_v37, %v117_v42  ;;  %v124_v48 = vadd.f32 %v114_v45, %v96_v36 }
  0x31   :  { %v125_v49 = vadd.f32 %v123_v47, %v97_v39  ;;  %406 = vlog2.f32 %v202_v43  ;;  %v204_v60 = vmul.f32 %v202_v43, %v669_v0  ;;  %v256_v0 = vld [vmem:[#allocation3] sm:$0xff]  ;;  %v294_v47 = vld [vmem:[%s718_s5] sm:$0x1] }
  0x32   :  { %v128_v52 = vmul.f32 %v124_v48, %v92_v44  ;;  %408 = vlog2.f32 %v124_v48 }
  0x33   :  { %v129_v53 = vmul.f32 %v125_v49, %v93_v46  ;;  %410 = vlog2.f32 %v125_v49  ;;  %v205_v11 = vadd.f32 %v204_v60, %v203_v5 }
  0x34   :  { %v130_v54 = vadd.f32 %v128_v52, %v126_v50 }
  0x35   :  { %v131_v55 = vadd.f32 %v129_v53, %v127_v51  ;;  %v206_v16 = vmul.f32 %v205_v11, %v205_v11  ;;  %v296_v51 = vand.u32 2147483647, %v294_v47 }
  0x36   :  { %v132_v56 = vmul.f32 %v130_v54, %v130_v54 }
  0x37   :  { %v407_v57 = vpop.eup %406  ;;  %v133_v58 = vmul.f32 %v131_v55, %v131_v55  ;;  %369 = vmatpush.xpose.msk.msra.mxu0 %vm134_vm4, %v131_v55  ;;  %v208_v17 = vsel %vm207_vm0, %v206_v16, 0.0 }
  0x38   :  { %v409_v59 = vpop.eup %408  ;;  %v135_v61 = vsel %vm134_vm4, %v132_v56, 0.0  ;;  %v234_v62 = vmul.f32 0.6931472, %v407_v57 }
  0x39   :  { %v411_v63 = vpop.eup %410  ;;  %v136_v1 = vsel %vm134_vm4, %v133_v58, 0.0  ;;  %v164_v2 = vmul.f32 0.6931472, %v409_v59 }
  0x3a   :  { %v137_v6 = vadd.f32 %v136_v1, %v135_v61  ;;  %v166_v7 = vmul.f32 0.6931472, %v411_v63  ;;  %v235_v8 = vsel %vm207_vm0, %v234_v62, 0.0 }
  0x3b   :  { %v167_v9 = vsel %vm134_vm4, %v164_v2, 0.0  ;;  %236 = vadd.xlane.f32.xlu2 %v235_v8  ;;  %370 = vmatpush.xpose.msk.msra.mxu0 %vm134_vm4, %v130_v54  ;;  %v297_v54 = vsub.f32 0.0, %v296_v51  ;;  %v257_v8 = vld [vmem:[#allocation2] sm:$0xff] }
  0x3c   :  { %138 = vadd.xlane.f32.xlu0 %v137_v6  ;;  %v168_v10 = vsel %vm134_vm4, %v166_v7, 0.0 }
  0x3d   :  { %v169_v12 = vadd.f32 %v168_v10, %v167_v9  ;;  %v298_v60 = vmul.f32 1.442695, %v297_v54 }
  0x3e   :  { %371 = vmatmul.msk.f32.vlgmr.msra.gmra.mxu0 %vm134_vm4, %v256_v0 }
  0x3f   :  { %170 = vadd.xlane.f32.xlu1 %v169_v12  ;;  %412 = vpow2.f32 %v298_v60  ;;  %v295_v12 = vmax.f32 %v294_v47, 0.0 }
  0x44   :  { %153 = vadd.xlane.f32.xlu0 %v152_v15  ;;  %v310_v15 = vld [vmem:[%s719_s6] sm:$0x1] }
  0x45   :  { %v413_v1 = vpop.eup %412 }
  0x46   :  { %v300_v2 = vadd.f32 1.0, %v413_v1  ;;  %v303_v4 = vmul.f32 -0.5, %v413_v1  ;;  %v306_v7 = vand.u32 2147483647, %v413_v1 }
  0x47   :  { %209 = vadd.xlane.f32.xlu1 %v208_v17  ;;  %v293_v17 = vld [vmem:[%s717_s4] sm:$0x1] }
  0x48   :  { %414 = vlog2.f32 %v300_v2  ;;  %v304_v5 = vadd.f32 1.0, %v303_v4  ;;  %vm307_vm6 = vcmp.lt.f32.partialorder %v306_v7, 0.0004427343 }
  0x4a   :  { %v305_v10 = vmul.f32 %v413_v1, %v304_v5 }
  0x4e   :  { %v415_v6 = vpop.eup %414 }
  0x4f   :  { %v302_v0 = vmul.f32 0.6931472, %v415_v6 }
  0x51   :  { %v308_v13 = vsel %vm307_vm6, %v305_v10, %v302_v0 }
  0x52   :  { %v309_v14 = vadd.f32 %v308_v13, %v295_v12 }
  0x54   :  { %v311_v16 = vmul.f32 %v310_v15, %v309_v14 }
  0x8b   :  { %v224_v18 = vpop.xlane.xlu2 %223 }
  0x8c   :  { %v225_v22 = vrot.slane %v224_v18, 4 }
  0x8e   :  { %v226_v29 = vadd.f32 %v225_v22, %v224_v18  ;;  %v312_v18 = vadd.f32 %v311_v16, %v293_v17 }
  0x90   :  { %v227_v36 = vrot.slane %v226_v29, 2 }
  0x92   :  { %v228_v46 = vadd.f32 %v227_v36, %v226_v29 }
  0x94   :  { %v229_v56 = vrot.slane %v228_v46, 1 }
  0x96   :  { %v230_v62 = vadd.f32 %v229_v56, %v228_v46 }
  0xae   :  { %v237_v21 = vpop.xlane.xlu2 %236 }
  0xaf   :  { %v139_v19 = vpop.xlane.xlu0 %138  ;;  %v238_v26 = vrot.slane %v237_v21, 4 }
  0xb0   :  { %v140_v20 = vrot.slane %v139_v19, 4 }
  0xb1   :  { %v239_v32 = vadd.f32 %v238_v26, %v237_v21 }
  0xb2   :  { %v141_v23 = vadd.f32 %v140_v20, %v139_v19  ;;  %v171_v24 = vpop.xlane.xlu1 %170  ;;  %v315_v19 = vperm.slane %v312_v18, 0 }
  0xb3   :  { %v172_v25 = vrot.slane %v171_v24, 4  ;;  %v240_v40 = vrot.slane %v239_v32, 2 }
  0xb4   :  { %v142_v27 = vrot.slane %v141_v23, 2 }
  0xb5   :  { %v173_v28 = vadd.f32 %v172_v25, %v171_v24  ;;  %v241_v48 = vadd.f32 %v240_v40, %v239_v32 }
  0xb6   :  { %v143_v30 = vadd.f32 %v142_v27, %v141_v23 }
  0xb7   :  { %v174_v31 = vrot.slane %v173_v28, 2  ;;  %v154_v33 = vpop.xlane.xlu0 %153  ;;  %v242_v59 = vrot.slane %v241_v48, 1 }
  0xb8   :  { %v155_v34 = vrot.slane %v154_v33, 4  ;;  %v144_v35 = vrot.slane %v143_v30, 1 }
  0xb9   :  { %v175_v42 = vadd.f32 %v174_v31, %v173_v28  ;;  %v243_v63 = vadd.f32 %v242_v59, %v241_v48 }
  0xba   :  { %v156_v37 = vadd.f32 %v155_v34, %v154_v33  ;;  %v210_v38 = vpop.xlane.xlu1 %209  ;;  %v145_v39 = vadd.f32 %v144_v35, %v143_v30 }
  0xbb   :  { %v211_v41 = vrot.slane %v210_v38, 4  ;;  %v176_v50 = vrot.slane %v175_v42, 1  ;;  %v284_v9 = vpop.f32.mrf.mxu0 }
  0xbc   :  { %v157_v43 = vrot.slane %v156_v37, 2  ;;  %372 = vpush %v145_v39  ;;  %v287_v11 = vadd.f32 %v284_v9, %v257_v8 }
  0xbd   :  { %v212_v44 = vadd.f32 %v211_v41, %v210_v38  ;;  %v177_v57 = vadd.f32 %v176_v50, %v175_v42 }
  0xbe   :  { %v158_v45 = vadd.f32 %v157_v43, %v156_v37  ;;  %289 = vst.msk [vmem:[#allocation2] sm:$0xff] %vm184_vm5, %v287_v11 }
  0xbf   :  { %v213_v49 = vrot.slane %v212_v44, 2 }
  0xc0   :  { %v159_v52 = vrot.slane %v158_v45, 1 }
  0xc1   :  { %v214_v53 = vadd.f32 %v213_v49, %v212_v44 }
  0xc2   :  { %v160_v55 = vadd.f32 %v159_v52, %v158_v45 }
  0xc3   :  { %v215_v58 = vrot.slane %v214_v53, 1 }
  0xc4   :  { %374 = vpush %v160_v55 }
  0xc5   :  { %376 = vpush %v177_v57  ;;  %v216_v61 = vadd.f32 %v215_v58, %v214_v53  ;;  %v313_v20 = vld [vmem:[#allocation2] sm:$0xff] }
  0xc6   :  { %v317_v21 = vadd.f32 %v315_v19, %v313_v20 }
  0xc7   :  { %378 = vpush %v216_v61 }
  0xc8   :  { %380 = vpush %v230_v62 }
  0xc9   :  { %382 = vpush %v243_v63 }
  0xca   :  { %318 = vst.msk [vmem:[#allocation11] sm:$0xff] %vm184_vm5, %v317_v21 }
  0xcb   :  { %329 = dma.vmem_to_hbm [thread:$0]  %s325_s18, 128, %s327_s21, [#allocation5]  }
  0xed   :  { %s373_s4 = spop %372 }
  0xee   :  { %s147_s27 = smul.f32 -0.5, %s373_s4 }
  0xf0   :  { %v249_v22 = vstv %s147_s27 }
  0xf5   :  { %s375_s25 = spop %374 }
  0xf6   :  { %s162_s26 = smul.f32 -0.5, %s375_s25  ;;  %s377_s7 = spop %376 }
  0xf8   :  { %s379_s0 = spop %378  ;;  %s179_s10 = ssub.f32 %s162_s26, %s377_s7 }
  0xf9   :  { %s218_s3 = smul.f32 -0.5, %s379_s0  ;;  %s381_s30 = spop %380 }
  0xfa   :  { %s232_s11 = smul.f32 -0.5, %s381_s30  ;;  %s383_s8 = spop %382  ;;  %v253_v25 = vstv %s179_s10 }
  0xfb   :  { %v219_v23 = vstv %s218_s3 }
  0xfc   :  { %s245_s5 = ssub.f32 %s232_s11, %s383_s8  ;;  %v250_v24 = vadd.f32 %v249_v22, %v219_v23 }
  0xfe   :  { %v246_v26 = vstv %s245_s5  ;;  %251 = vst [vmem:[#allocation12] sm:$0xff] %v250_v24 }
  0xff   :  { %340 = dma.vmem_to_hbm [thread:$0]  %s336_s24, 128, %s338_s23, [#allocation13]   ;;  %v254_v27 = vadd.f32 %v253_v25, %v246_v26 }
 0x101   :  { %255 = vst [vmem:[#allocation14] sm:$0xff] %v254_v27 }
 0x102   :  { %351 = dma.vmem_to_hbm [thread:$0]  %s347_s13, 128, %s349_s29, [#allocation13]  }
 0x103   :  { %590 = dma.done.wait [#allocation5], 128  }
 0x104   :  { %591 = vsyncadd [#allocation5], 4294967168 }
 0x105   :  { %592 = dma.done.wait [#allocation13], 256  }
 0x106   :  { %593 = vsyncadd [#allocation13], 4294967040 }
 0x107   :  { %364 = vsyncpa [#allocation4], 1 }
 0x108   :  { %365 = vsyncpa [#allocation7], 1 }
 0x109   :  { %366 = vsyncpa [#allocation10], 1 }
 0x10a   :  { %367 = vsyncpa [#allocation5], 1 }
 0x10b   :  { %368 = vsyncpa [#allocation13], 1 }

</bundles_post_ra>
